<compile_context>
chip_gen: v5e
topology: v5e:2x2
jax: 0.10.0
libtpu: 0.0.40
codegen_flags: <defaults>
</compile_context>

<pallas_src>
import functools

import jax
import jax.numpy as jnp
from jax.experimental import pallas as pl
from jax.experimental.pallas import tpu as pltpu


def _layernorm_torch(x, gamma, beta, eps):
    """LayerNorm exactly as the PyTorch module writes it: unbiased std, eps on std."""
    d = x.shape[-1]
    mean = jnp.mean(x, axis=-1, keepdims=True)
    xc = x - mean
    var_unbiased = jnp.sum(xc * xc, axis=-1, keepdims=True) * (1.0 / float(d - 1))
    inv = 1.0 / (jnp.sqrt(var_unbiased) + eps)            # one reciprocal per row
    return xc * inv * gamma + beta


def _encoder_layer_kernel(x_ref,
                          w1_ref, b1_ref, g1_ref, be1_ref,
                          w2_ref, b2_ref, g2_ref, be2_ref,
                          *rest, p_drop, eps, compute_dtype):
    if p_drop > 0.0:
        bits1_ref, bits2_ref, o_ref = rest
    else:
        (o_ref,) = rest

    x = x_ref[...].astype(jnp.float32)                     # (tm, D)

    def dropout(y, bits_ref):
        if p_drop <= 0.0:
            return y
        thr = jnp.uint32(min(int(round(p_drop * 4294967296.0)), 4294967295))
        keep = bits_ref[...] >= thr                        # single uint32 compare
        return jnp.where(keep, y * (1.0 / (1.0 - p_drop)), 0.0)

    # ---- sublayer[0]: x + dropout(self_attn_standin(norm(x))) ----
    # TODO(synk): plug a real multi-head self-attention here (would consume `mask`);
    # the Linear(D, D) stand-in ignores it.
    n1 = _layernorm_torch(x, g1_ref[...].astype(jnp.float32),
                          be1_ref[...].astype(jnp.float32), eps)
    y1 = jnp.dot(n1.astype(compute_dtype), w1_ref[...].astype(compute_dtype),
                 preferred_element_type=jnp.float32)
    y1 = y1 + b1_ref[...].astype(jnp.float32)
    y1 = dropout(y1, bits1_ref if p_drop > 0.0 else None)
    h = x + y1

    # ---- sublayer[1]: h + dropout(feed_forward_standin(norm(h))) ----
    # TODO(synk): replace the Linear stand-in with the real position-wise FFN
    # (Linear -> ReLU -> Linear) once that module is specified.
    n2 = _layernorm_torch(h, g2_ref[...].astype(jnp.float32),
                          be2_ref[...].astype(jnp.float32), eps)
    y2 = jnp.dot(n2.astype(compute_dtype), w2_ref[...].astype(compute_dtype),
                 preferred_element_type=jnp.float32)
    y2 = y2 + b2_ref[...].astype(jnp.float32)
    y2 = dropout(y2, bits2_ref if p_drop > 0.0 else None)

    o_ref[...] = (h + y2).astype(o_ref.dtype)


def _pick_tile(total, want, align):
    """Largest tile <= want that divides `total` and is a multiple of `align`
    (or the full extent, which is always a legal block shape)."""
    if total <= want:
        return total
    t = (want // align) * align
    while t >= align:
        if total % t == 0:
            return t
        t -= align
    return total


def encoder_layer(x, mask, params, *, p_drop=0.1, eps=1e-6, rng_key=None,
                  tm=256, matmul_in_bf16=False):
    """EncoderLayer.forward: x -> two fused SublayerConnections. x: (B, S, D)."""
    del mask  # consumed only by the (unspecified) real attention module
    B, S, D = x.shape
    M = B * S
    x2 = x.reshape(M, D)
    tm = _pick_tile(M, tm, 8)

    compute_dtype = jnp.bfloat16 if matmul_in_bf16 else jnp.float32

    row_spec = pl.BlockSpec((tm, D), lambda i: (i, 0))
    vec_spec = pl.BlockSpec((1, D), lambda i: (0, 0))
    w_spec = pl.BlockSpec((D, D), lambda i: (0, 0))   # constant index: fetched once

    inputs = [x2,
              params["w_attn"], params["b_attn"].reshape(1, D),
              params["a2_0"].reshape(1, D), params["b2_0"].reshape(1, D),
              params["w_ff"], params["b_ff"].reshape(1, D),
              params["a2_1"].reshape(1, D), params["b2_1"].reshape(1, D)]
    in_specs = [row_spec,
                w_spec, vec_spec, vec_spec, vec_spec,
                w_spec, vec_spec, vec_spec, vec_spec]

    if p_drop > 0.0:
        if rng_key is None:
            raise ValueError("rng_key is required when p_drop > 0")
        k1, k2 = jax.random.split(rng_key)
        bits1 = jax.random.bits(k1, (M, D), dtype=jnp.uint32)
        bits2 = jax.random.bits(k2, (M, D), dtype=jnp.uint32)
        inputs += [bits1, bits2]
        in_specs += [row_spec, row_spec]

    kernel = functools.partial(_encoder_layer_kernel, p_drop=float(p_drop),
                               eps=float(eps), compute_dtype=compute_dtype)

    x_item = jnp.dtype(x.dtype).itemsize
    w_item = jnp.dtype(params["w_attn"].dtype).itemsize

    flops = 2 * (2 * M * D * D)                            # two D x D matmuls
    bytes_accessed = (2 * M * D * x_item                   # x in + out
                      + 2 * D * D * w_item                 # W1 + W2 (fetched once)
                      + (2 * M * D * 4 if p_drop > 0.0 else 0))

    per_step_vmem = (2 * tm * D * x_item                   # x rows (double buffer)
                     + 2 * 2 * D * D * w_item              # W1, W2 (double buffer)
                     + 2 * tm * D * x_item                 # output (double buffer)
                     + (4 * tm * D * 4 if p_drop > 0.0 else 0)
                     + 16 * D * 4)                         # 1-D params
    vmem_limit = int(min(max(per_step_vmem * 2 + (4 << 20), 32 << 20), 64 << 20))

    out = pl.pallas_call(
        kernel,
        out_shape=jax.ShapeDtypeStruct((M, D), x.dtype),
        grid=(M // tm,),
        in_specs=in_specs,
        out_specs=pl.BlockSpec((tm, D), lambda i: (i, 0)),
        compiler_params=pltpu.CompilerParams(
            dimension_semantics=("parallel",),
            vmem_limit_bytes=vmem_limit),
        cost_estimate=pl.CostEstimate(flops=flops, transcendentals=4 * M,
                                      bytes_accessed=bytes_accessed),
    )(*inputs)
    return out.reshape(B, S, D)


# ----------------------------- pure-JAX reference -----------------------------
def _ref_sublayer(x, w, b, a2, b2, eps=1e-6):
    mean = jnp.mean(x, axis=-1, keepdims=True)
    xc = x - mean
    d = x.shape[-1]
    std = jnp.sqrt(jnp.sum(xc * xc, axis=-1, keepdims=True) / (d - 1))
    normed = a2 * xc / (std + eps) + b2
    y = jnp.dot(normed, w, precision=jax.lax.Precision.HIGHEST) + b
    return x + y


def _ref_encoder_layer(x, params, eps=1e-6):
    x = _ref_sublayer(x, params["w_attn"], params["b_attn"],
                      params["a2_0"], params["b2_0"], eps)
    return _ref_sublayer(x, params["w_ff"], params["b_ff"],
                         params["a2_1"], params["b2_1"], eps)


if __name__ == "__main__":
    B, S, D = 2, 8, 256    # batch, seq, hidden ("size"); D lane-dense (multiple of 128)
    key = jax.random.PRNGKey(0)
    kx, ka, kf, kba, kbf, kdrop = jax.random.split(key, 6)

    x = jax.random.normal(kx, (B, S, D), dtype=jnp.float32)
    mask = jnp.ones((B, 1, S, S), dtype=jnp.float32)   # accepted but unused (stand-in)

    params = {
        "a2_0": jnp.ones((D,), jnp.float32), "b2_0": jnp.zeros((D,), jnp.float32),
        "w_attn": jax.random.normal(ka, (D, D), jnp.float32) / jnp.sqrt(D),
        "b_attn": jax.random.normal(kba, (D,), jnp.float32) * 0.01,
        "a2_1": jnp.ones((D,), jnp.float32), "b2_1": jnp.zeros((D,), jnp.float32),
        "w_ff": jax.random.normal(kf, (D, D), jnp.float32) / jnp.sqrt(D),
        "b_ff": jax.random.normal(kbf, (D,), jnp.float32) * 0.01,
    }

    # Correctness smoke test vs pure-JAX reference with dropout disabled.
    out_check = encoder_layer(x, mask, params, p_drop=0.0)
    ref = _ref_encoder_layer(x, params)
    err = float(jnp.max(jnp.abs(out_check - ref)))
    assert err < 5e-2, f"mismatch vs reference: max abs err {err}"

    # Training-mode forward with dropout p=0.1 (the module default path).
    out = encoder_layer(x, mask, params, p_drop=0.1, rng_key=kdrop)
    jax.block_until_ready(out)
    assert out.shape == (B, S, D)
    print("KERNEL_OK")
</pallas_src>

<mosaic_0001>
module attributes {stable_mosaic.version = 11 : i64} {
  func.func @_encoder_layer_kernel(%arg0: i32, %arg1: memref<16x256xf32, #tpu.memory_space<vmem>>, %arg2: memref<256x256xf32, #tpu.memory_space<vmem>>, %arg3: memref<1x256xf32, #tpu.memory_space<vmem>>, %arg4: memref<1x256xf32, #tpu.memory_space<vmem>>, %arg5: memref<1x256xf32, #tpu.memory_space<vmem>>, %arg6: memref<256x256xf32, #tpu.memory_space<vmem>>, %arg7: memref<1x256xf32, #tpu.memory_space<vmem>>, %arg8: memref<1x256xf32, #tpu.memory_space<vmem>>, %arg9: memref<1x256xf32, #tpu.memory_space<vmem>>, %arg10: memref<16x256xf32, #tpu.memory_space<vmem>>) attributes {dimension_semantics = [#tpu.dimension_semantics<parallel>], iteration_bounds = array<i64: 1>, scalar_prefetch = 0 : i64, scratch_operands = 0 : i64, tpu.core_type = #tpu.core_type<tc>, window_params = [{transform_indices = @transform_0, window_bounds = array<i64: 16, 256>}, {pipeline_mode = #tpu.pipeline_mode<synchronous>, transform_indices = @transform_1, window_bounds = array<i64: 256, 256>}, {pipeline_mode = #tpu.pipeline_mode<synchronous>, transform_indices = @transform_2, window_bounds = array<i64: 1, 256>}, {pipeline_mode = #tpu.pipeline_mode<synchronous>, transform_indices = @transform_3, window_bounds = array<i64: 1, 256>}, {pipeline_mode = #tpu.pipeline_mode<synchronous>, transform_indices = @transform_4, window_bounds = array<i64: 1, 256>}, {pipeline_mode = #tpu.pipeline_mode<synchronous>, transform_indices = @transform_5, window_bounds = array<i64: 256, 256>}, {pipeline_mode = #tpu.pipeline_mode<synchronous>, transform_indices = @transform_6, window_bounds = array<i64: 1, 256>}, {pipeline_mode = #tpu.pipeline_mode<synchronous>, transform_indices = @transform_7, window_bounds = array<i64: 1, 256>}, {pipeline_mode = #tpu.pipeline_mode<synchronous>, transform_indices = @transform_8, window_bounds = array<i64: 1, 256>}, {transform_indices = @transform_9, window_bounds = array<i64: 16, 256>}]} {
    %c0 = arith.constant 0 : index
    %c0_0 = arith.constant 0 : index
    %0 = vector.load %arg1[%c0, %c0_0] : memref<16x256xf32, #tpu.memory_space<vmem>>, vector<16x256xf32>
    %c0_1 = arith.constant 0 : index
    %c0_2 = arith.constant 0 : index
    %1 = vector.load %arg4[%c0_1, %c0_2] : memref<1x256xf32, #tpu.memory_space<vmem>>, vector<1x256xf32>
    %c0_3 = arith.constant 0 : index
    %c0_4 = arith.constant 0 : index
    %2 = vector.load %arg5[%c0_3, %c0_4] : memref<1x256xf32, #tpu.memory_space<vmem>>, vector<1x256xf32>
    %cst = arith.constant dense<0.000000e+00> : vector<16xf32>
    %3 = vector.multi_reduction <add>, %0, %cst [1] : vector<16x256xf32> to vector<16xf32>
    %4 = vector.shape_cast %3 : vector<16xf32> to vector<16x1xf32>
    %cst_5 = arith.constant 2.560000e+02 : f32
    %5 = vector.broadcast %cst_5 : f32 to vector<16x1xf32>
    %6 = arith.divf %4, %5 : vector<16x1xf32>
    %7 = vector.broadcast %6 : vector<16x1xf32> to vector<16x256xf32>
    %8 = arith.subf %0, %7 : vector<16x256xf32>
    %9 = arith.mulf %8, %8 : vector<16x256xf32>
    %cst_6 = arith.constant dense<0.000000e+00> : vector<16xf32>
    %10 = vector.multi_reduction <add>, %9, %cst_6 [1] : vector<16x256xf32> to vector<16xf32>
    %11 = vector.shape_cast %10 : vector<16xf32> to vector<16x1xf32>
    %cst_7 = arith.constant 0.00392156886 : f32
    %12 = vector.broadcast %cst_7 : f32 to vector<16x1xf32>
    %13 = arith.mulf %11, %12 : vector<16x1xf32>
    %14 = math.sqrt %13 : vector<16x1xf32>
    %cst_8 = arith.constant 9.99999997E-7 : f32
    %15 = vector.broadcast %cst_8 : f32 to vector<16x1xf32>
    %16 = arith.addf %14, %15 : vector<16x1xf32>
    %cst_9 = arith.constant 1.000000e+00 : f32
    %17 = vector.broadcast %cst_9 : f32 to vector<16x1xf32>
    %18 = arith.divf %17, %16 : vector<16x1xf32>
    %19 = vector.broadcast %18 : vector<16x1xf32> to vector<16x256xf32>
    %20 = arith.mulf %8, %19 : vector<16x256xf32>
    %21 = vector.broadcast %1 : vector<1x256xf32> to vector<16x256xf32>
    %22 = arith.mulf %20, %21 : vector<16x256xf32>
    %23 = vector.broadcast %2 : vector<1x256xf32> to vector<16x256xf32>
    %24 = arith.addf %22, %23 : vector<16x256xf32>
    %c0_10 = arith.constant 0 : index
    %c0_11 = arith.constant 0 : index
    %25 = vector.load %arg2[%c0_10, %c0_11] : memref<256x256xf32, #tpu.memory_space<vmem>>, vector<256x256xf32>
    %cst_12 = arith.constant dense<0.000000e+00> : vector<16x256xf32>
    %26 = tpu.matmul %24, %25, %cst_12 {dimension_numbers = #tpu.dot_dimension_numbers<[1], [0], [0], [1], [0, 0, 1, 1], [], []>} : vector<16x256xf32>, vector<256x256xf32>, vector<16x256xf32> -> vector<16x256xf32>
    %c0_13 = arith.constant 0 : index
    %c0_14 = arith.constant 0 : index
    %27 = vector.load %arg3[%c0_13, %c0_14] : memref<1x256xf32, #tpu.memory_space<vmem>>, vector<1x256xf32>
    %28 = vector.broadcast %27 : vector<1x256xf32> to vector<16x256xf32>
    %29 = arith.addf %26, %28 : vector<16x256xf32>
    %30 = arith.addf %0, %29 : vector<16x256xf32>
    %c0_15 = arith.constant 0 : index
    %c0_16 = arith.constant 0 : index
    %31 = vector.load %arg8[%c0_15, %c0_16] : memref<1x256xf32, #tpu.memory_space<vmem>>, vector<1x256xf32>
    %c0_17 = arith.constant 0 : index
    %c0_18 = arith.constant 0 : index
    %32 = vector.load %arg9[%c0_17, %c0_18] : memref<1x256xf32, #tpu.memory_space<vmem>>, vector<1x256xf32>
    %cst_19 = arith.constant dense<0.000000e+00> : vector<16xf32>
    %33 = vector.multi_reduction <add>, %30, %cst_19 [1] : vector<16x256xf32> to vector<16xf32>
    %34 = vector.shape_cast %33 : vector<16xf32> to vector<16x1xf32>
    %cst_20 = arith.constant 2.560000e+02 : f32
    %35 = vector.broadcast %cst_20 : f32 to vector<16x1xf32>
    %36 = arith.divf %34, %35 : vector<16x1xf32>
    %37 = vector.broadcast %36 : vector<16x1xf32> to vector<16x256xf32>
    %38 = arith.subf %30, %37 : vector<16x256xf32>
    %39 = arith.mulf %38, %38 : vector<16x256xf32>
    %cst_21 = arith.constant dense<0.000000e+00> : vector<16xf32>
    %40 = vector.multi_reduction <add>, %39, %cst_21 [1] : vector<16x256xf32> to vector<16xf32>
    %41 = vector.shape_cast %40 : vector<16xf32> to vector<16x1xf32>
    %cst_22 = arith.constant 0.00392156886 : f32
    %42 = vector.broadcast %cst_22 : f32 to vector<16x1xf32>
    %43 = arith.mulf %41, %42 : vector<16x1xf32>
    %44 = math.sqrt %43 : vector<16x1xf32>
    %cst_23 = arith.constant 9.99999997E-7 : f32
    %45 = vector.broadcast %cst_23 : f32 to vector<16x1xf32>
    %46 = arith.addf %44, %45 : vector<16x1xf32>
    %cst_24 = arith.constant 1.000000e+00 : f32
    %47 = vector.broadcast %cst_24 : f32 to vector<16x1xf32>
    %48 = arith.divf %47, %46 : vector<16x1xf32>
    %49 = vector.broadcast %48 : vector<16x1xf32> to vector<16x256xf32>
    %50 = arith.mulf %38, %49 : vector<16x256xf32>
    %51 = vector.broadcast %31 : vector<1x256xf32> to vector<16x256xf32>
    %52 = arith.mulf %50, %51 : vector<16x256xf32>
    %53 = vector.broadcast %32 : vector<1x256xf32> to vector<16x256xf32>
    %54 = arith.addf %52, %53 : vector<16x256xf32>
    %c0_25 = arith.constant 0 : index
    %c0_26 = arith.constant 0 : index
    %55 = vector.load %arg6[%c0_25, %c0_26] : memref<256x256xf32, #tpu.memory_space<vmem>>, vector<256x256xf32>
    %cst_27 = arith.constant dense<0.000000e+00> : vector<16x256xf32>
    %56 = tpu.matmul %54, %55, %cst_27 {dimension_numbers = #tpu.dot_dimension_numbers<[1], [0], [0], [1], [0, 0, 1, 1], [], []>} : vector<16x256xf32>, vector<256x256xf32>, vector<16x256xf32> -> vector<16x256xf32>
    %c0_28 = arith.constant 0 : index
    %c0_29 = arith.constant 0 : index
    %57 = vector.load %arg7[%c0_28, %c0_29] : memref<1x256xf32, #tpu.memory_space<vmem>>, vector<1x256xf32>
    %58 = vector.broadcast %57 : vector<1x256xf32> to vector<16x256xf32>
    %59 = arith.addf %56, %58 : vector<16x256xf32>
    %60 = arith.addf %30, %59 : vector<16x256xf32>
    %c0_30 = arith.constant 0 : index
    %c0_31 = arith.constant 0 : index
    %61 = vector.load %arg10[%c0_30, %c0_31] : memref<16x256xf32, #tpu.memory_space<vmem>>, vector<16x256xf32>
    tpu.vector_store %arg10[%c0_30, %c0_31], %60 {strides = array<i32>} : memref<16x256xf32, #tpu.memory_space<vmem>>, vector<16x256xf32>,
    return
  }
  func.func @transform_0(%arg0: i32) -> (i32, i32) {
    %c0_i32 = arith.constant 0 : i32
    %c0_i32_0 = arith.constant 0 : i32
    return %arg0, %c0_i32 : i32, i32
  }
  func.func @transform_1(%arg0: i32) -> (i32, i32) {
    %c0_i32 = arith.constant 0 : i32
    %c0_i32_0 = arith.constant 0 : i32
    %c0_i32_1 = arith.constant 0 : i32
    return %c0_i32, %c0_i32_0 : i32, i32
  }
  func.func @transform_2(%arg0: i32) -> (i32, i32) {
    %c0_i32 = arith.constant 0 : i32
    %c0_i32_0 = arith.constant 0 : i32
    %c0_i32_1 = arith.constant 0 : i32
    return %c0_i32, %c0_i32_0 : i32, i32
  }
  func.func @transform_3(%arg0: i32) -> (i32, i32) {
    %c0_i32 = arith.constant 0 : i32
    %c0_i32_0 = arith.constant 0 : i32
    %c0_i32_1 = arith.constant 0 : i32
    return %c0_i32, %c0_i32_0 : i32, i32
  }
  func.func @transform_4(%arg0: i32) -> (i32, i32) {
    %c0_i32 = arith.constant 0 : i32
    %c0_i32_0 = arith.constant 0 : i32
    %c0_i32_1 = arith.constant 0 : i32
    return %c0_i32, %c0_i32_0 : i32, i32
  }
  func.func @transform_5(%arg0: i32) -> (i32, i32) {
    %c0_i32 = arith.constant 0 : i32
    %c0_i32_0 = arith.constant 0 : i32
    %c0_i32_1 = arith.constant 0 : i32
    return %c0_i32, %c0_i32_0 : i32, i32
  }
  func.func @transform_6(%arg0: i32) -> (i32, i32) {
    %c0_i32 = arith.constant 0 : i32
    %c0_i32_0 = arith.constant 0 : i32
    %c0_i32_1 = arith.constant 0 : i32
    return %c0_i32, %c0_i32_0 : i32, i32
  }
  func.func @transform_7(%arg0: i32) -> (i32, i32) {
    %c0_i32 = arith.constant 0 : i32
    %c0_i32_0 = arith.constant 0 : i32
    %c0_i32_1 = arith.constant 0 : i32
    return %c0_i32, %c0_i32_0 : i32, i32
  }
  func.func @transform_8(%arg0: i32) -> (i32, i32) {
    %c0_i32 = arith.constant 0 : i32
    %c0_i32_0 = arith.constant 0 : i32
    %c0_i32_1 = arith.constant 0 : i32
    return %c0_i32, %c0_i32_0 : i32, i32
  }
  func.func @transform_9(%arg0: i32) -> (i32, i32) {
    %c0_i32 = arith.constant 0 : i32
    %c0_i32_0 = arith.constant 0 : i32
    return %arg0, %c0_i32 : i32, i32
  }
}

</mosaic_0001>

<bundles_post_ra>
// kernel: tpu_custom_call.1
= control target key start
LH: loop header
LB: loop body
LE: loop exit
PB: predicated region body
PF: predicated region fallthrough
CT: control target
= control target key end

     0   :  { %14 = vsyncpa [#allocation3], 0  ;;  %s1110_s0 = inlined_call_operand.hbm [shape: f32[16,256], index: 0, kind: input, shape index: {}]   ;;  %s1111_s1 = inlined_call_operand.hbm [shape: f32[256,256], index: 1, kind: input, shape index: {}]   ;;  %s1112_s2 = inlined_call_operand.hbm [shape: f32[1,256], index: 2, kind: input, shape index: {}]   ;;  %s1113_s3 = inlined_call_operand.vmem [shape: f32[1,256], index: 3, kind: input, shape index: {}]   ;;  %s1114_s4 = inlined_call_operand.hbm [shape: f32[1,256], index: 4, kind: input, shape index: {}]   ;;  %s1115_s5 = inlined_call_operand.hbm [shape: f32[256,256], index: 5, kind: input, shape index: {}]   ;;  %s1116_s6 = inlined_call_operand.vmem [shape: f32[1,256], index: 6, kind: input, shape index: {}]   ;;  %s1117_s7 = inlined_call_operand.vmem [shape: f32[1,256], index: 7, kind: input, shape index: {}]   ;;  %s1118_s8 = inlined_call_operand.hbm [shape: f32[1,256], index: 8, kind: input, shape index: {}]   ;;  %s1119_s9 = inlined_call_operand.hbm [shape: f32[16,256], index: 9, kind: output, shape index: {}]  }
   0x1   :  { %15 = vsyncpa [#allocation6], 0 }
   0x2   :  { %16 = vsyncpa [#allocation9], 0 }
   0x3   :  { %17 = vsyncpa [#allocation12], 0 }
   0x4   :  { %18 = vsyncpa [#allocation4], 0  ;;  %s36_s11 = sshll.u32 %s1111_s1, 4  ;;  %s904_s12 = smov [#allocation5]   ;;  %s37_s11 = int_to_ptr.hbm [resolvable:$true] %s36_s11 }
   0x5   :  { %s38_s13 = sshll.u32 %s904_s12, 4  ;;  %s63_s16 = sshll.u32 %s1114_s4, 4  ;;  %s39_s13 = int_to_ptr.vmem [resolvable:$true] %s38_s13  ;;  %s64_s16 = int_to_ptr.hbm [resolvable:$true] %s63_s16 }
   0x6   :  { %s905_s17 = smov 256   ;;  %s906_s18 = smov 16  }
   0x7   :  { %44 = dma.hbm_to_vmem [thread:$0]  %s37_s11, 8192, %s39_s13, [#allocation6], %s905_s17, %s905_s17, %s906_s18  }
   0x8   :  { %s907_s19 = smov [#allocation8]   ;;  %s23_s1 = sshll.u32 %s1110_s0, 4  ;;  %s24_s1 = int_to_ptr.hbm [resolvable:$true] %s23_s1 }
   0x9   :  { %s65_s20 = sshll.u32 %s907_s19, 4  ;;  %s50_s4 = sshll.u32 %s1112_s2, 4  ;;  %s66_s20 = int_to_ptr.vmem [resolvable:$true] %s65_s20  ;;  %s51_s4 = int_to_ptr.hbm [resolvable:$true] %s50_s4 }
   0xa   :  { %68 = dma.hbm_to_vmem [thread:$0]  %s64_s16, 32, %s66_s20, [#allocation9]  }
   0xb   :  { %s908_s25 = smov [#allocation2]   ;;  %s909_s27 = smov [#allocation7]  }
   0xc   :  { %s25_s26 = sshll.u32 %s908_s25, 4  ;;  %s52_s28 = sshll.u32 %s909_s27, 4  ;;  %s26_s26 = int_to_ptr.vmem [resolvable:$true] %s25_s26  ;;  %s53_s28 = int_to_ptr.vmem [resolvable:$true] %s52_s28 }
   0xd   :  { %31 = dma.hbm_to_vmem [thread:$0]  %s24_s1, 512, %s26_s26, [#allocation3], %s905_s17, %s905_s17, %s906_s18  }
   0xe   :  { %s73_s0 = sshll.u32 %s1115_s5, 4  ;;  %s91_s2 = sshll.u32 %s1118_s8, 4  ;;  %s74_s0 = int_to_ptr.hbm [resolvable:$true] %s73_s0  ;;  %s92_s2 = int_to_ptr.hbm [resolvable:$true] %s91_s2 }
   0xf   :  { %55 = dma.hbm_to_vmem [thread:$0]  %s51_s4, 32, %s53_s28, [#allocation6]  }
  0x10   :  { %s910_s12 = smov [#allocation10]   ;;  %s911_s14 = smov [#allocation11]  }
  0x11   :  { %s75_s13 = sshll.u32 %s910_s12, 4  ;;  %s93_s15 = sshll.u32 %s911_s14, 4  ;;  %s76_s13 = int_to_ptr.vmem [resolvable:$true] %s75_s13  ;;  %s94_s15 = int_to_ptr.vmem [resolvable:$true] %s93_s15 }
  0x12   :  { %81 = dma.hbm_to_vmem [thread:$0]  %s74_s0, 8192, %s76_s13, [#allocation9], %s905_s17, %s905_s17, %s906_s18  }
  0x13   :  { %96 = dma.hbm_to_vmem [thread:$0]  %s92_s2, 32, %s94_s15, [#allocation12]  }
  0x14   :  { %894 = dma.done.wait [#allocation3], 512  }
  0x15   :  { %895 = vsyncadd [#allocation3], 4294966784 }
  0x16   :  { %896 = dma.done.wait [#allocation6], 8224  }
  0x17   :  { %897 = vsyncadd [#allocation6], 4294959072 }
  0x18   :  { %898 = dma.done.wait [#allocation9], 8224  }
  0x19   :  { %899 = vsyncadd [#allocation9], 4294959072 }
  0x1a   :  { %900 = dma.done.wait [#allocation12], 32  }
  0x1b   :  { %901 = vsyncadd [#allocation12], 4294967264  ;;  %v991_v0 = vld [vmem:[#allocation2] sm:$0xff]  ;;  %v993_v1 = vld [vmem:[#allocation2 + $0x8] sm:$0xff]  ;;  %v912_v6 = vmov 256.0   ;;  %s682_s1 = sshll.u32 %s1119_s9, 4  ;;  %s683_s1 = int_to_ptr.hbm [resolvable:$true] %s682_s1 }
  0x1c   :  { %v127_v2 = vadd.f32 %v993_v1, %v991_v0  ;;  %v997_v3 = vld [vmem:[#allocation2 + $0x10] sm:$0xff]  ;;  %v999_v4 = vld [vmem:[#allocation2 + $0x18] sm:$0xff]  ;;  %708 = vrcp.f32 %v912_v6  ;;  %v264_v31 = vld [vmem:[#allocation5 + $0xe0] sm:$0xff] }
  0x1d   :  { %v130_v5 = vadd.f32 %v999_v4, %v997_v3  ;;  %v266_v27 = vld [vmem:[#allocation5 + $0xf0] sm:$0xff]  ;;  %v267_v29 = vld [vmem:[#allocation5 + $0xf8] sm:$0xff]  ;;  %v296_v32 = vld [vmem:[#allocation5 + $0x1e0] sm:$0xff] }
  0x1e   :  { %128 = vadd.xlane.f32.xlu0 %v127_v2  ;;  %v298_v28 = vld [vmem:[#allocation5 + $0x1f0] sm:$0xff]  ;;  %306 = vmatpush.msra.mxu0 %v266_v27  ;;  %v299_v30 = vld [vmem:[#allocation5 + $0x1f8] sm:$0xff]  ;;  %v265_v33 = vld [vmem:[#allocation5 + $0xe8] sm:$0xff] }
  0x1f   :  { %329 = vmatpush.msra.mxu1 %v298_v28  ;;  %352 = vmatpush.msra.mxu2 %v267_v29  ;;  %v297_v34 = vld [vmem:[#allocation5 + $0x1e8] sm:$0xff]  ;;  %v262_v35 = vld [vmem:[#allocation5 + $0xd0] sm:$0xff]  ;;  %v263_v37 = vld [vmem:[#allocation5 + $0xd8] sm:$0xff] }
  0x20   :  { %375 = vmatpush.msra.mxu3 %v299_v30  ;;  %307 = vmatpush.msra.mxu0 %v264_v31  ;;  %v294_v36 = vld [vmem:[#allocation5 + $0x1d0] sm:$0xff]  ;;  %v295_v38 = vld [vmem:[#allocation5 + $0x1d8] sm:$0xff]  ;;  %v260_v39 = vld [vmem:[#allocation5 + $0xc0] sm:$0xff] }
  0x21   :  { %330 = vmatpush.msra.mxu1 %v296_v32  ;;  %353 = vmatpush.msra.mxu2 %v265_v33  ;;  %v292_v40 = vld [vmem:[#allocation5 + $0x1c0] sm:$0xff]  ;;  %v261_v41 = vld [vmem:[#allocation5 + $0xc8] sm:$0xff]  ;;  %v258_v43 = vld [vmem:[#allocation5 + $0xb0] sm:$0xff] }
  0x22   :  { %v709_v7 = vpop.eup %708  ;;  %376 = vmatpush.msra.mxu3 %v297_v34  ;;  %308 = vmatpush.msra.mxu0 %v262_v35  ;;  %v293_v42 = vld [vmem:[#allocation5 + $0x1c8] sm:$0xff]  ;;  %v290_v44 = vld [vmem:[#allocation5 + $0x1b0] sm:$0xff]  ;;  %v259_v45 = vld [vmem:[#allocation5 + $0xb8] sm:$0xff] }
  0x23   :  { %v134_v8 = vmul.f32 256.0, %v709_v7  ;;  %vm138_vm0 = vweird.f32 %v709_v7  ;;  %331 = vmatpush.msra.mxu1 %v294_v36  ;;  %354 = vmatpush.msra.mxu2 %v263_v37  ;;  %v291_v46 = vld [vmem:[#allocation5 + $0x1b8] sm:$0xff]  ;;  %v256_v47 = vld [vmem:[#allocation5 + $0xa0] sm:$0xff]  ;;  %v257_v49 = vld [vmem:[#allocation5 + $0xa8] sm:$0xff] }
  0x24   :  { %377 = vmatpush.msra.mxu3 %v295_v38  ;;  %309 = vmatpush.msra.mxu0 %v260_v39  ;;  %v288_v48 = vld [vmem:[#allocation5 + $0x1a0] sm:$0xff]  ;;  %v289_v50 = vld [vmem:[#allocation5 + $0x1a8] sm:$0xff]  ;;  %v254_v51 = vld [vmem:[#allocation5 + $0x90] sm:$0xff] }
  0x25   :  { %v135_v9 = vsub.f32 1.0, %v134_v8  ;;  %332 = vmatpush.msra.mxu1 %v292_v40  ;;  %355 = vmatpush.msra.mxu2 %v261_v41  ;;  %v286_v52 = vld [vmem:[#allocation5 + $0x190] sm:$0xff]  ;;  %v255_v53 = vld [vmem:[#allocation5 + $0x98] sm:$0xff]  ;;  %v252_v55 = vld [vmem:[#allocation5 + $0x80] sm:$0xff] }
  0x26   :  { %131 = vadd.xlane.f32.xlu0 %v130_v5  ;;  %378 = vmatpush.msra.mxu3 %v293_v42  ;;  %v287_v54 = vld [vmem:[#allocation5 + $0x198] sm:$0xff]  ;;  %v284_v56 = vld [vmem:[#allocation5 + $0x180] sm:$0xff]  ;;  %v253_v57 = vld [vmem:[#allocation5 + $0x88] sm:$0xff] }
  0x27   :  { %v136_v10 = vmul.f32 %v709_v7, %v135_v9  ;;  %310 = vmatpush.msra.mxu0 %v258_v43  ;;  %333 = vmatpush.msra.mxu1 %v290_v44  ;;  %v285_v58 = vld [vmem:[#allocation5 + $0x188] sm:$0xff]  ;;  %v250_v59 = vld [vmem:[#allocation5 + $0x70] sm:$0xff]  ;;  %v251_v62 = vld [vmem:[#allocation5 + $0x78] sm:$0xff] }
  0x28   :  { %356 = vmatpush.msra.mxu2 %v259_v45  ;;  %379 = vmatpush.msra.mxu3 %v291_v46  ;;  %v282_v60 = vld [vmem:[#allocation5 + $0x170] sm:$0xff]  ;;  %v283_v63 = vld [vmem:[#allocation5 + $0x178] sm:$0xff]  ;;  %v248_v5 = vld [vmem:[#allocation5 + $0x60] sm:$0xff] }
  0x29   :  { %v137_v11 = vadd.f32 %v709_v7, %v136_v10  ;;  %311 = vmatpush.msra.mxu0 %v256_v47  ;;  %334 = vmatpush.msra.mxu1 %v288_v48  ;;  %v280_v6 = vld [vmem:[#allocation5 + $0x160] sm:$0xff]  ;;  %v281_v8 = vld [vmem:[#allocation5 + $0x168] sm:$0xff]  ;;  %v246_v9 = vld [vmem:[#allocation5 + $0x50] sm:$0xff] }
  0x2a   :  { %357 = vmatpush.msra.mxu2 %v257_v49  ;;  %380 = vmatpush.msra.mxu3 %v289_v50  ;;  %v278_v10 = vld [vmem:[#allocation5 + $0x150] sm:$0xff]  ;;  %v240_v29 = vld [vmem:[#allocation5 + $0x20] sm:$0xff]  ;;  %v241_v32 = vld [vmem:[#allocation5 + $0x28] sm:$0xff] }
  0x2b   :  { %v1003_v12 = vsel %vm138_vm0, %v709_v7, %v137_v11  ;;  %312 = vmatpush.msra.mxu0 %v254_v51  ;;  %335 = vmatpush.msra.mxu1 %v286_v52  ;;  %v249_v7 = vld [vmem:[#allocation5 + $0x68] sm:$0xff]  ;;  %v247_v11 = vld [vmem:[#allocation5 + $0x58] sm:$0xff]  ;;  %v272_v30 = vld [vmem:[#allocation5 + $0x120] sm:$0xff] }
  0x2c   :  { %358 = vmatpush.msra.mxu2 %v255_v53  ;;  %381 = vmatpush.msra.mxu3 %v287_v54  ;;  %v273_v33 = vld [vmem:[#allocation5 + $0x128] sm:$0xff]  ;;  %v238_v34 = vld [vmem:[#allocation5 + $0x10] sm:$0xff]  ;;  %v239_v37 = vld [vmem:[#allocation5 + $0x18] sm:$0xff] }
  0x2d   :  { %313 = vmatpush.msra.mxu0 %v252_v55  ;;  %336 = vmatpush.msra.mxu1 %v284_v56  ;;  %v270_v35 = vld [vmem:[#allocation5 + $0x110] sm:$0xff]  ;;  %v271_v38 = vld [vmem:[#allocation5 + $0x118] sm:$0xff]  ;;  %v236_v39 = vld [vmem:[#allocation5] sm:$0xff] }
  0x2e   :  { %359 = vmatpush.msra.mxu2 %v253_v57  ;;  %382 = vmatpush.msra.mxu3 %v285_v58  ;;  %v268_v40 = vld [vmem:[#allocation5 + $0x100] sm:$0xff]  ;;  %v237_v42 = vld [vmem:[#allocation5 + $0x8] sm:$0xff] }
  0x2f   :  { %314 = vmatpush.msra.mxu0 %v250_v59  ;;  %337 = vmatpush.msra.mxu1 %v282_v60  ;;  %v269_v43 = vld [vmem:[#allocation5 + $0x108] sm:$0xff] }
  0x30   :  { %360 = vmatpush.msra.mxu2 %v251_v62  ;;  %383 = vmatpush.msra.mxu3 %v283_v63 }
  0x31   :  { %315 = vmatpush.msra.mxu0 %v248_v5  ;;  %338 = vmatpush.msra.mxu1 %v280_v6 }
  0x32   :  { %361 = vmatpush.msra.mxu2 %v249_v7  ;;  %384 = vmatpush.msra.mxu3 %v281_v8 }
  0x33   :  { %316 = vmatpush.msra.mxu0 %v246_v9  ;;  %339 = vmatpush.msra.mxu1 %v278_v10  ;;  %v126_v9 = vld [vmem:[#allocation8] sm:$0x3] }
  0x34   :  { %362 = vmatpush.msra.mxu2 %v247_v11 }
  0x91   :  { %v129_v13 = vpop.xlane.xlu0 %128 }
  0x92   :  { %v140_v14 = vmul.f32 %v1003_v12, %v129_v13  ;;  %v279_v13 = vld [vmem:[#allocation5 + $0x158] sm:$0xff] }
  0x93   :  { %385 = vmatpush.msra.mxu3 %v279_v13 }
  0x94   :  { %v1007_v15 = vsub.f32 %v991_v0, %v140_v14  ;;  %v1010_v16 = vsub.f32 %v993_v1, %v140_v14  ;;  %v244_v14 = vld [vmem:[#allocation5 + $0x40] sm:$0xff] }
  0x95   :  { %317 = vmatpush.msra.mxu0 %v244_v14 }
  0x96   :  { %v146_v17 = vmul.f32 %v1007_v15, %v1007_v15  ;;  %v147_v18 = vmul.f32 %v1010_v16, %v1010_v16 }
  0x98   :  { %v150_v19 = vadd.f32 %v147_v18, %v146_v17  ;;  %v276_v17 = vld [vmem:[#allocation5 + $0x140] sm:$0xff]  ;;  %v245_v18 = vld [vmem:[#allocation5 + $0x48] sm:$0xff] }
  0x99   :  { %v132_v20 = vpop.xlane.xlu0 %131  ;;  %340 = vmatpush.msra.mxu1 %v276_v17  ;;  %363 = vmatpush.msra.mxu2 %v245_v18 }
  0x9a   :  { %v141_v21 = vmul.f32 %v1003_v12, %v132_v20  ;;  %151 = vadd.xlane.f32.xlu1 %v150_v19  ;;  %v277_v19 = vld [vmem:[#allocation5 + $0x148] sm:$0xff]  ;;  %v242_v20 = vld [vmem:[#allocation5 + $0x30] sm:$0xff] }
  0x9b   :  { %386 = vmatpush.msra.mxu3 %v277_v19  ;;  %318 = vmatpush.msra.mxu0 %v242_v20 }
  0x9c   :  { %v1018_v22 = vsub.f32 %v997_v3, %v141_v21  ;;  %v1021_v23 = vsub.f32 %v999_v4, %v141_v21  ;;  %v274_v21 = vld [vmem:[#allocation5 + $0x130] sm:$0xff] }
  0x9d   :  { %341 = vmatpush.msra.mxu1 %v274_v21  ;;  %319 = vmatpush.msra.mxu0 %v240_v29  ;;  %v228_v21 = vperm.slane %v126_v9, 0 }
  0x9e   :  { %v148_v24 = vmul.f32 %v1018_v22, %v1018_v22  ;;  %v149_v25 = vmul.f32 %v1021_v23, %v1021_v23 }
  0x9f   :  { %342 = vmatpush.msra.mxu1 %v272_v30  ;;  %320 = vmatpush.msra.mxu0 %v238_v34 }
  0xa0   :  { %v153_v26 = vadd.f32 %v149_v25, %v148_v24  ;;  %v243_v25 = vld [vmem:[#allocation5 + $0x38] sm:$0xff] }
  0xa1   :  { %364 = vmatpush.msra.mxu2 %v243_v25  ;;  %343 = vmatpush.msra.mxu1 %v270_v35 }
  0xa2   :  { %154 = vadd.xlane.f32.xlu1 %v153_v26  ;;  %v275_v26 = vld [vmem:[#allocation5 + $0x138] sm:$0xff]  ;;  %321 = vmatpush.msra.mxu0 %v236_v39 }
  0xa3   :  { %387 = vmatpush.msra.mxu3 %v275_v26  ;;  %365 = vmatpush.msra.mxu2 %v241_v32  ;;  %v229_v26 = vperm.slane %v126_v9, 1 }
  0xa4   :  { %344 = vmatpush.msra.mxu1 %v268_v40 }
  0xa5   :  { %388 = vmatpush.msra.mxu3 %v273_v33  ;;  %366 = vmatpush.msra.mxu2 %v239_v37 }
  0xa7   :  { %389 = vmatpush.msra.mxu3 %v271_v38  ;;  %367 = vmatpush.msra.mxu2 %v237_v42 }
  0xa9   :  { %390 = vmatpush.msra.mxu3 %v269_v43  ;;  %v300_v43 = vld [vmem:[#allocation7] sm:$0x3] }
 0x10d   :  { %v152_v61 = vpop.xlane.xlu1 %151 }
 0x10e   :  { %v1027_v2 = vmul.f32 0.003921569, %v152_v61 }
 0x110   :  { %710 = vrsqrt.f32 %v1027_v2  ;;  %vm165_vm1 = vcmp.eq.f32.partialorder %v1027_v2, inf  ;;  %v168_v50 = vand.u32 2147483648, %v1027_v2  ;;  %vm167_vm2 = vcmp.eq.f32.partialorder %v1027_v2, 0.0 }
 0x115   :  { %v155_v24 = vpop.xlane.xlu1 %154 }
 0x116   :  { %v711_v27 = vpop.eup %710  ;;  %v157_v28 = vmul.f32 0.003921569, %v155_v24 }
 0x117   :  { %v159_v31 = vmul.f32 %v711_v27, %v1027_v2 }
 0x118   :  { %712 = vrsqrt.f32 %v157_v28  ;;  %vm177_vm3 = vcmp.eq.f32.partialorder %v157_v28, inf  ;;  %v180_v58 = vand.u32 2147483648, %v157_v28  ;;  %vm179_vm4 = vcmp.eq.f32.partialorder %v157_v28, 0.0 }
 0x119   :  { %v160_v36 = vmul.f32 %v711_v27, %v159_v31 }
 0x11b   :  { %v161_v41 = vmul.f32 0.5, %v160_v36 }
 0x11d   :  { %v162_v44 = vsub.f32 1.5, %v161_v41 }
 0x11e   :  { %v713_v45 = vpop.eup %712 }
 0x11f   :  { %v163_v46 = vmul.f32 %v711_v27, %v162_v44  ;;  %v171_v47 = vmul.f32 %v713_v45, %v157_v28  ;;  %v302_v44 = vperm.slane %v300_v43, 0 }
 0x121   :  { %v164_v48 = vmul.f32 %v163_v46, %v1027_v2  ;;  %v172_v49 = vmul.f32 %v713_v45, %v171_v47  ;;  %v303_v47 = vperm.slane %v300_v43, 1  ;;  %v556_v43 = vld [vmem:[#allocation10 + $0x190] sm:$0xff] }
 0x123   :  { %v173_v51 = vmul.f32 0.5, %v172_v49  ;;  %v166_v52 = vsel %vm165_vm1, %v1027_v2, %v164_v48  ;;  %v125_v2 = vld [vmem:[%s1113_s3] sm:$0x3] }
 0x124   :  { %v169_v53 = vsel %vm167_vm2, %v168_v50, %v166_v52  ;;  %v219_v14 = vperm.slane %v125_v2, 0  ;;  %v220_v18 = vperm.slane %v125_v2, 1 }
 0x125   :  { %v174_v54 = vsub.f32 1.5, %v173_v51  ;;  %v182_v55 = vadd.f32 1e-06, %v169_v53 }
 0x127   :  { %v175_v56 = vmul.f32 %v713_v45, %v174_v54  ;;  %714 = vrcp.f32 %v182_v55  ;;  %v195_v6 = vand.u32 2147483648, %v182_v55  ;;  %v193_v8 = vand.u32 2147483647, %v182_v55 }
 0x128   :  { %vm189_vm6 = vweird.f32 %v182_v55 }
 0x129   :  { %v176_v57 = vmul.f32 %v175_v56, %v157_v28  ;;  %v196_v13 = vor.u32 1.1754944e-38, %v195_v6  ;;  %vm194_vm8 = vcmp.eq.f32.partialorder %v193_v8, 8.507059e+37 }
 0x12b   :  { %v178_v59 = vsel %vm177_vm3, %v157_v28, %v176_v57 }
 0x12c   :  { %v181_v60 = vsel %vm179_vm4, %v180_v58, %v178_v59 }
 0x12d   :  { %v715_v61 = vpop.eup %714  ;;  %v183_v62 = vadd.f32 1e-06, %v181_v60 }
 0x12e   :  { %v185_v63 = vmul.f32 %v715_v61, %v182_v55  ;;  %vm190_vm5 = vweird.f32 %v715_v61 }
 0x12f   :  { %716 = vrcp.f32 %v183_v62  ;;  %vm191_vm7 = vmor %vm189_vm6, %vm190_vm5  ;;  %v208_v28 = vand.u32 2147483647, %v183_v62  ;;  %v210_v29 = vand.u32 2147483648, %v183_v62  ;;  %vm204_vm10 = vweird.f32 %v183_v62 }
 0x130   :  { %v186_v5 = vsub.f32 1.0, %v185_v63 }
 0x131   :  { %v211_v36 = vor.u32 1.1754944e-38, %v210_v29  ;;  %vm209_vm12 = vcmp.eq.f32.partialorder %v208_v28, 8.507059e+37  ;;  %v532_v28 = vld [vmem:[#allocation10 + $0xd0] sm:$0xff] }
 0x132   :  { %v187_v7 = vmul.f32 %v715_v61, %v186_v5  ;;  %v564_v29 = vld [vmem:[#allocation10 + $0x1d0] sm:$0xff] }
 0x134   :  { %v188_v10 = vadd.f32 %v715_v61, %v187_v7 }
 0x135   :  { %v717_v11 = vpop.eup %716 }
 0x136   :  { %v192_v17 = vsel %vm191_vm7, %v715_v61, %v188_v10  ;;  %v200_v19 = vmul.f32 %v717_v11, %v183_v62  ;;  %vm205_vm9 = vweird.f32 %v717_v11 }
 0x137   :  { %v197_v20 = vsel %vm194_vm8, %v196_v13, %v192_v17  ;;  %vm206_vm11 = vmor %vm204_vm10, %vm205_vm9 }
 0x138   :  { %v214_v24 = vmul.f32 %v197_v20, %v1007_v15  ;;  %v215_v25 = vmul.f32 %v197_v20, %v1010_v16  ;;  %v201_v27 = vsub.f32 1.0, %v200_v19  ;;  %v536_v19 = vld [vmem:[#allocation10 + $0xf0] sm:$0xff] }
 0x139   :  { %v568_v20 = vld [vmem:[#allocation10 + $0x1f0] sm:$0xff]  ;;  %576 = vmatpush.msrb.mxu0 %v536_v19 }
 0x13a   :  { %v223_v30 = vmul.f32 %v219_v14, %v214_v24  ;;  %v224_v31 = vmul.f32 %v220_v18, %v215_v25  ;;  %v202_v32 = vmul.f32 %v717_v11, %v201_v27  ;;  %599 = vmatpush.msrb.mxu1 %v568_v20  ;;  %v534_v24 = vld [vmem:[#allocation10 + $0xe0] sm:$0xff]  ;;  %v567_v27 = vld [vmem:[#allocation10 + $0x1e8] sm:$0xff] }
 0x13b   :  { %v566_v25 = vld [vmem:[#allocation10 + $0x1e0] sm:$0xff]  ;;  %577 = vmatpush.msrb.mxu0 %v534_v24  ;;  %v511_v24 = vld [vmem:[#allocation10 + $0x28] sm:$0xff] }
 0x13c   :  { %v232_v33 = vadd.f32 %v228_v21, %v223_v30  ;;  %v233_v34 = vadd.f32 %v229_v26, %v224_v31  ;;  %v203_v35 = vadd.f32 %v717_v11, %v202_v32  ;;  %600 = vmatpush.msrb.mxu1 %v566_v25  ;;  %v533_v30 = vld [vmem:[#allocation10 + $0xd8] sm:$0xff]  ;;  %v530_v32 = vld [vmem:[#allocation10 + $0xc0] sm:$0xff]  ;;  %v543_v25 = vld [vmem:[#allocation10 + $0x128] sm:$0xff] }
 0x13d   :  { %578 = vmatpush.msrb.mxu0 %v532_v28  ;;  %v565_v31 = vld [vmem:[#allocation10 + $0x1d8] sm:$0xff]  ;;  %v510_v20 = vld [vmem:[#allocation10 + $0x20] sm:$0xff] }
 0x13e   :  { %322 = vmatmul.f32.vlgmr.msra.gmra.mxu0 %v232_v33  ;;  %345 = vmatmul.f32.vlgmr.msra.gmra.mxu1 %v233_v34  ;;  %v207_v37 = vsel %vm206_vm11, %v717_v11, %v203_v35  ;;  %v563_v35 = vld [vmem:[#allocation10 + $0x1c8] sm:$0xff] }
 0x13f   :  { %368 = vmatmul.f32.vlgmr.msra.gmra.mxu2 %v232_v33  ;;  %391 = vmatmul.f32.vlgmr.msra.gmra.mxu3 %v233_v34  ;;  %v212_v15 = vsel %vm209_vm12, %v211_v36, %v207_v37  ;;  %v562_v33 = vld [vmem:[#allocation10 + $0x1c0] sm:$0xff]  ;;  %v531_v34 = vld [vmem:[#allocation10 + $0xc8] sm:$0xff]  ;;  %v528_v36 = vld [vmem:[#allocation10 + $0xb0] sm:$0xff] }
 0x140   :  { %v216_v16 = vmul.f32 %v212_v15, %v1018_v22  ;;  %v217_v38 = vmul.f32 %v212_v15, %v1021_v23  ;;  %601 = vmatpush.msrb.mxu1 %v564_v29  ;;  %579 = vmatpush.msrb.mxu0 %v530_v32  ;;  %v560_v37 = vld [vmem:[#allocation10 + $0x1b0] sm:$0xff]  ;;  %v529_v15 = vld [vmem:[#allocation10 + $0xb8] sm:$0xff]  ;;  %v538_v32 = vld [vmem:[#allocation10 + $0x100] sm:$0xff] }
 0x141   :  { %v509_v29 = vld [vmem:[#allocation10 + $0x18] sm:$0xff] }
 0x142   :  { %v225_v39 = vmul.f32 %v219_v14, %v216_v16  ;;  %v226_v40 = vmul.f32 %v220_v18, %v217_v38  ;;  %602 = vmatpush.msrb.mxu1 %v562_v33  ;;  %580 = vmatpush.msrb.mxu0 %v528_v36  ;;  %v561_v16 = vld [vmem:[#allocation10 + $0x1b8] sm:$0xff]  ;;  %v526_v38 = vld [vmem:[#allocation10 + $0xa0] sm:$0xff] }
 0x144   :  { %v234_v41 = vadd.f32 %v228_v21, %v225_v39  ;;  %v235_v42 = vadd.f32 %v229_v26, %v226_v40  ;;  %v537_v21 = vld [vmem:[#allocation10 + $0xf8] sm:$0xff]  ;;  %v535_v26 = vld [vmem:[#allocation10 + $0xe8] sm:$0xff]  ;;  %603 = vmatpush.msrb.mxu1 %v560_v37  ;;  %v558_v39 = vld [vmem:[#allocation10 + $0x1a0] sm:$0xff]  ;;  %581 = vmatpush.msrb.mxu0 %v526_v38 }
 0x145   :  { %622 = vmatpush.msrb.mxu2 %v537_v21  ;;  %v527_v40 = vld [vmem:[#allocation10 + $0xa8] sm:$0xff]  ;;  %v542_v21 = vld [vmem:[#allocation10 + $0x120] sm:$0xff] }
 0x146   :  { %325 = vmatmul.f32.gmra.mxu0 %v234_v41  ;;  %348 = vmatmul.f32.gmra.mxu1 %v235_v42 }
 0x147   :  { %371 = vmatmul.f32.gmra.mxu2 %v234_v41  ;;  %394 = vmatmul.f32.gmra.mxu3 %v235_v42  ;;  %v559_v41 = vld [vmem:[#allocation10 + $0x1a8] sm:$0xff]  ;;  %v524_v42 = vld [vmem:[#allocation10 + $0x90] sm:$0xff] }
 0x148   :  { %623 = vmatpush.msrb.mxu2 %v535_v26  ;;  %604 = vmatpush.msrb.mxu1 %v558_v39  ;;  %v508_v26 = vld [vmem:[#allocation10 + $0x10] sm:$0xff] }
 0x149   :  { %582 = vmatpush.msrb.mxu0 %v524_v42 }
 0x14a   :  { %624 = vmatpush.msrb.mxu2 %v533_v30  ;;  %605 = vmatpush.msrb.mxu1 %v556_v43  ;;  %v541_v30 = vld [vmem:[#allocation10 + $0x118] sm:$0xff] }
 0x14c   :  { %625 = vmatpush.msrb.mxu2 %v531_v34  ;;  %v507_v34 = vld [vmem:[#allocation10 + $0x8] sm:$0xff] }
 0x14e   :  { %626 = vmatpush.msrb.mxu2 %v529_v15 }
 0x150   :  { %627 = vmatpush.msrb.mxu2 %v527_v40 }
 0x1bb   :  { %v323_v45 = vpop.f32.mrf.mxu0  ;;  %v346_v48 = vpop.f32.mrf.mxu1 }
 0x1bc   :  { %v324_v46 = vadd.f32 %v323_v45, %v302_v44  ;;  %v557_v45 = vld [vmem:[#allocation10 + $0x198] sm:$0xff] }
 0x1be   :  { %v347_v51 = vadd.f32 %v346_v48, %v324_v46  ;;  %v522_v46 = vld [vmem:[#allocation10 + $0x80] sm:$0xff]  ;;  %v523_v48 = vld [vmem:[#allocation10 + $0x88] sm:$0xff] }
 0x1bf   :  { %583 = vmatpush.msrb.mxu0 %v522_v46 }
 0x1c0   :  { %v1044_v53 = vadd.f32 %v347_v51, %v991_v0  ;;  %v552_v51 = vld [vmem:[#allocation10 + $0x170] sm:$0xff] }
 0x1c2   :  { %v369_v49 = vpop.f32.mrf.mxu2  ;;  %v392_v50 = vpop.f32.mrf.mxu3 }
 0x1c3   :  { %v370_v22 = vadd.f32 %v369_v49, %v303_v47  ;;  %v326_v52 = vpop.f32.mrf.mxu0  ;;  %v349_v57 = vpop.f32.mrf.mxu1  ;;  %v555_v49 = vld [vmem:[#allocation10 + $0x188] sm:$0xff] }
 0x1c4   :  { %v327_v55 = vadd.f32 %v326_v52, %v302_v44  ;;  %v525_v44 = vld [vmem:[#allocation10 + $0x98] sm:$0xff] }
 0x1c5   :  { %v393_v23 = vadd.f32 %v392_v50, %v370_v22  ;;  %628 = vmatpush.msrb.mxu2 %v525_v44  ;;  %v520_v50 = vld [vmem:[#allocation10 + $0x70] sm:$0xff]  ;;  %v521_v52 = vld [vmem:[#allocation10 + $0x78] sm:$0xff] }
 0x1c6   :  { %v350_v59 = vadd.f32 %v349_v57, %v327_v55  ;;  %v550_v57 = vld [vmem:[#allocation10 + $0x160] sm:$0xff]  ;;  %584 = vmatpush.msrb.mxu0 %v520_v50 }
 0x1c7   :  { %v1047_v54 = vadd.f32 %v393_v23, %v993_v1  ;;  %v553_v23 = vld [vmem:[#allocation10 + $0x178] sm:$0xff]  ;;  %629 = vmatpush.msrb.mxu2 %v523_v48 }
 0x1c8   :  { %v1052_v63 = vadd.f32 %v350_v59, %v997_v3  ;;  %v551_v59 = vld [vmem:[#allocation10 + $0x168] sm:$0xff] }
 0x1c9   :  { %v404_v56 = vadd.f32 %v1047_v54, %v1044_v53  ;;  %630 = vmatpush.msrb.mxu2 %v521_v52 }
 0x1ca   :  { %v372_v58 = vpop.f32.mrf.mxu2  ;;  %v395_v61 = vpop.f32.mrf.mxu3 }
 0x1cb   :  { %v373_v60 = vadd.f32 %v372_v58, %v303_v47  ;;  %405 = vadd.xlane.f32.xlu2 %v404_v56  ;;  %v554_v47 = vld [vmem:[#allocation10 + $0x180] sm:$0xff]  ;;  %v519_v58 = vld [vmem:[#allocation10 + $0x68] sm:$0xff] }
 0x1cc   :  { %606 = vmatpush.msrb.mxu1 %v554_v47  ;;  %v518_v56 = vld [vmem:[#allocation10 + $0x60] sm:$0xff]  ;;  %631 = vmatpush.msrb.mxu2 %v519_v58 }
 0x1cd   :  { %v396_v62 = vadd.f32 %v395_v61, %v373_v60  ;;  %v516_v60 = vld [vmem:[#allocation10 + $0x50] sm:$0xff]  ;;  %585 = vmatpush.msrb.mxu0 %v518_v56 }
 0x1ce   :  { %607 = vmatpush.msrb.mxu1 %v552_v51  ;;  %v548_v61 = vld [vmem:[#allocation10 + $0x150] sm:$0xff] }
 0x1cf   :  { %v1055_v0 = vadd.f32 %v396_v62, %v999_v4  ;;  %v517_v62 = vld [vmem:[#allocation10 + $0x58] sm:$0xff]  ;;  %586 = vmatpush.msrb.mxu0 %v516_v60 }
 0x1d0   :  { %608 = vmatpush.msrb.mxu1 %v550_v57  ;;  %632 = vmatpush.msrb.mxu2 %v517_v62 }
 0x1d1   :  { %v407_v1 = vadd.f32 %v1055_v0, %v1052_v63 }
 0x1d2   :  { %609 = vmatpush.msrb.mxu1 %v548_v61 }
 0x1d3   :  { %408 = vadd.xlane.f32.xlu2 %v407_v1  ;;  %v549_v1 = vld [vmem:[#allocation10 + $0x158] sm:$0xff] }
 0x23e   :  { %v406_v5 = vpop.xlane.xlu2 %405 }
 0x23f   :  { %v410_v6 = vmul.f32 %v406_v5, %v1003_v12  ;;  %v514_v5 = vld [vmem:[#allocation10 + $0x40] sm:$0xff] }
 0x240   :  { %587 = vmatpush.msrb.mxu0 %v514_v5 }
 0x241   :  { %v1061_v2 = vsub.f32 %v1044_v53, %v410_v6  ;;  %v1064_v7 = vsub.f32 %v1047_v54, %v410_v6  ;;  %v546_v6 = vld [vmem:[#allocation10 + $0x140] sm:$0xff] }
 0x242   :  { %610 = vmatpush.msrb.mxu1 %v546_v6 }
 0x243   :  { %v416_v3 = vmul.f32 %v1061_v2, %v1061_v2  ;;  %v417_v4 = vmul.f32 %v1064_v7, %v1064_v7 }
 0x245   :  { %v420_v8 = vadd.f32 %v417_v4, %v416_v3  ;;  %v515_v3 = vld [vmem:[#allocation10 + $0x48] sm:$0xff] }
 0x246   :  { %v409_v9 = vpop.xlane.xlu2 %408  ;;  %v547_v4 = vld [vmem:[#allocation10 + $0x148] sm:$0xff]  ;;  %633 = vmatpush.msrb.mxu2 %v515_v3 }
 0x247   :  { %v411_v10 = vmul.f32 %v409_v9, %v1003_v12  ;;  %421 = vadd.xlane.f32.xlu0 %v420_v8  ;;  %v569_v12 = vld [vmem:[#allocation10 + $0x1f8] sm:$0xff]  ;;  %v512_v8 = vld [vmem:[#allocation10 + $0x30] sm:$0xff] }
 0x248   :  { %645 = vmatpush.msrb.mxu3 %v569_v12  ;;  %v544_v9 = vld [vmem:[#allocation10 + $0x130] sm:$0xff]  ;;  %588 = vmatpush.msrb.mxu0 %v512_v8 }
 0x249   :  { %v1072_v11 = vsub.f32 %v1052_v63, %v411_v10  ;;  %v1075_v13 = vsub.f32 %v1055_v0, %v411_v10  ;;  %611 = vmatpush.msrb.mxu1 %v544_v9 }
 0x24a   :  { %646 = vmatpush.msrb.mxu3 %v567_v27  ;;  %v540_v27 = vld [vmem:[#allocation10 + $0x110] sm:$0xff]  ;;  %589 = vmatpush.msrb.mxu0 %v510_v20 }
 0x24b   :  { %v418_v14 = vmul.f32 %v1072_v11, %v1072_v11  ;;  %v419_v17 = vmul.f32 %v1075_v13, %v1075_v13  ;;  %612 = vmatpush.msrb.mxu1 %v542_v21 }
 0x24c   :  { %647 = vmatpush.msrb.mxu3 %v565_v31  ;;  %v506_v31 = vld [vmem:[#allocation10] sm:$0xff]  ;;  %590 = vmatpush.msrb.mxu0 %v508_v26 }
 0x24d   :  { %v423_v18 = vadd.f32 %v419_v17, %v418_v14  ;;  %v513_v14 = vld [vmem:[#allocation10 + $0x38] sm:$0xff]  ;;  %613 = vmatpush.msrb.mxu1 %v540_v27 }
 0x24e   :  { %648 = vmatpush.msrb.mxu3 %v563_v35  ;;  %v545_v17 = vld [vmem:[#allocation10 + $0x138] sm:$0xff]  ;;  %634 = vmatpush.msrb.mxu2 %v513_v14  ;;  %v539_v35 = vld [vmem:[#allocation10 + $0x108] sm:$0xff] }
 0x24f   :  { %424 = vadd.xlane.f32.xlu1 %v423_v18  ;;  %591 = vmatpush.msrb.mxu0 %v506_v31 }
 0x250   :  { %649 = vmatpush.msrb.mxu3 %v561_v16  ;;  %635 = vmatpush.msrb.mxu2 %v511_v24 }
 0x251   :  { %614 = vmatpush.msrb.mxu1 %v538_v32 }
 0x252   :  { %650 = vmatpush.msrb.mxu3 %v559_v41  ;;  %636 = vmatpush.msrb.mxu2 %v509_v29 }
 0x254   :  { %651 = vmatpush.msrb.mxu3 %v557_v45  ;;  %637 = vmatpush.msrb.mxu2 %v507_v34  ;;  %v570_v34 = vld [vmem:[%s1116_s6] sm:$0x3]  ;;  %s913_s6 = smov [#allocation13]  }
 0x255   :  { %s680_s20 = sshll.u32 %s913_s6, 4  ;;  %s681_s20 = int_to_ptr.vmem [resolvable:$true] %s680_s20 }
 0x256   :  { %652 = vmatpush.msrb.mxu3 %v555_v49 }
 0x258   :  { %653 = vmatpush.msrb.mxu3 %v553_v23 }
 0x25a   :  { %654 = vmatpush.msrb.mxu3 %v551_v59  ;;  %v403_v59 = vld [vmem:[#allocation11] sm:$0x3] }
 0x25b   :  { %v498_v8 = vperm.slane %v403_v59, 0  ;;  %v499_v14 = vperm.slane %v403_v59, 1 }
 0x25c   :  { %655 = vmatpush.msrb.mxu3 %v549_v1 }
 0x25e   :  { %656 = vmatpush.msrb.mxu3 %v547_v4 }
 0x260   :  { %657 = vmatpush.msrb.mxu3 %v545_v17 }
 0x262   :  { %658 = vmatpush.msrb.mxu3 %v543_v25 }
 0x264   :  { %659 = vmatpush.msrb.mxu3 %v541_v30 }
 0x266   :  { %660 = vmatpush.msrb.mxu3 %v539_v35  ;;  %v572_v35 = vperm.slane %v570_v34, 0 }
 0x2ba   :  { %v422_v22 = vpop.xlane.xlu0 %421 }
 0x2bb   :  { %v1081_v55 = vmul.f32 0.003921569, %v422_v22 }
 0x2bd   :  { %718 = vrsqrt.f32 %v1081_v55  ;;  %vm435_vm13 = vcmp.eq.f32.partialorder %v1081_v55, inf  ;;  %v438_v40 = vand.u32 2147483648, %v1081_v55  ;;  %vm437_vm14 = vcmp.eq.f32.partialorder %v1081_v55, 0.0 }
 0x2c2   :  { %v425_v10 = vpop.xlane.xlu1 %424 }
 0x2c3   :  { %v719_v18 = vpop.eup %718  ;;  %v427_v19 = vmul.f32 0.003921569, %v425_v10 }
 0x2c4   :  { %v429_v12 = vmul.f32 %v719_v18, %v1081_v55 }
 0x2c5   :  { %720 = vrsqrt.f32 %v427_v19  ;;  %vm447_vm15 = vcmp.eq.f32.partialorder %v427_v19, inf  ;;  %v450_v48 = vand.u32 2147483648, %v427_v19  ;;  %vm449_vm0 = vcmp.eq.f32.partialorder %v427_v19, 0.0 }
 0x2c6   :  { %v430_v28 = vmul.f32 %v719_v18, %v429_v12 }
 0x2c8   :  { %v431_v33 = vmul.f32 0.5, %v430_v28 }
 0x2ca   :  { %v432_v36 = vsub.f32 1.5, %v431_v33 }
 0x2cb   :  { %v721_v37 = vpop.eup %720 }
 0x2cc   :  { %v433_v15 = vmul.f32 %v719_v18, %v432_v36  ;;  %v441_v16 = vmul.f32 %v721_v37, %v427_v19 }
 0x2ce   :  { %v434_v38 = vmul.f32 %v433_v15, %v1081_v55  ;;  %v442_v39 = vmul.f32 %v721_v37, %v441_v16 }
 0x2d0   :  { %v436_v41 = vsel %vm435_vm13, %v1081_v55, %v434_v38  ;;  %v443_v42 = vmul.f32 0.5, %v442_v39  ;;  %v402_v55 = vld [vmem:[%s1117_s7] sm:$0x3] }
 0x2d1   :  { %v439_v43 = vsel %vm437_vm14, %v438_v40, %v436_v41  ;;  %v489_v1 = vperm.slane %v402_v55, 0  ;;  %v490_v6 = vperm.slane %v402_v55, 1 }
 0x2d2   :  { %v444_v44 = vsub.f32 1.5, %v443_v42  ;;  %v452_v45 = vadd.f32 1e-06, %v439_v43 }
 0x2d4   :  { %v445_v46 = vmul.f32 %v721_v37, %v444_v44  ;;  %722 = vrcp.f32 %v452_v45  ;;  %v465_v56 = vand.u32 2147483648, %v452_v45  ;;  %v463_v58 = vand.u32 2147483647, %v452_v45 }
 0x2d5   :  { %vm459_vm2 = vweird.f32 %v452_v45 }
 0x2d6   :  { %v446_v47 = vmul.f32 %v445_v46, %v427_v19  ;;  %v466_v62 = vor.u32 1.1754944e-38, %v465_v56  ;;  %vm464_vm4 = vcmp.eq.f32.partialorder %v463_v58, 8.507059e+37 }
 0x2d8   :  { %v448_v49 = vsel %vm447_vm15, %v427_v19, %v446_v47 }
 0x2d9   :  { %v451_v50 = vsel %vm449_vm0, %v450_v48, %v448_v49 }
 0x2da   :  { %v723_v51 = vpop.eup %722  ;;  %v453_v22 = vadd.f32 1e-06, %v451_v50 }
 0x2db   :  { %v455_v52 = vmul.f32 %v723_v51, %v452_v45  ;;  %vm460_vm1 = vweird.f32 %v723_v51 }
 0x2dc   :  { %724 = vrcp.f32 %v453_v22  ;;  %vm461_vm3 = vmor %vm459_vm2, %vm460_vm1  ;;  %v478_v18 = vand.u32 2147483647, %v453_v22  ;;  %v480_v19 = vand.u32 2147483648, %v453_v22  ;;  %vm474_vm6 = vweird.f32 %v453_v22 }
 0x2dd   :  { %v456_v23 = vsub.f32 1.0, %v455_v52 }
 0x2de   :  { %v481_v27 = vor.u32 1.1754944e-38, %v480_v19  ;;  %vm479_vm8 = vcmp.eq.f32.partialorder %v478_v18, 8.507059e+37 }
 0x2df   :  { %v457_v57 = vmul.f32 %v723_v51, %v456_v23 }
 0x2e1   :  { %v458_v60 = vadd.f32 %v723_v51, %v457_v57 }
 0x2e2   :  { %v725_v61 = vpop.eup %724 }
 0x2e3   :  { %v462_v5 = vsel %vm461_vm3, %v723_v51, %v458_v60  ;;  %v470_v3 = vmul.f32 %v725_v61, %v453_v22  ;;  %vm475_vm5 = vweird.f32 %v725_v61 }
 0x2e4   :  { %v467_v4 = vsel %vm464_vm4, %v466_v62, %v462_v5  ;;  %vm476_vm7 = vmor %vm474_vm6, %vm475_vm5 }
 0x2e5   :  { %v484_v9 = vmul.f32 %v467_v4, %v1061_v2  ;;  %v485_v10 = vmul.f32 %v467_v4, %v1064_v7  ;;  %v471_v17 = vsub.f32 1.0, %v470_v3 }
 0x2e7   :  { %v493_v20 = vmul.f32 %v489_v1, %v484_v9  ;;  %v494_v21 = vmul.f32 %v490_v6, %v485_v10  ;;  %v472_v12 = vmul.f32 %v725_v61, %v471_v17 }
 0x2e9   :  { %v502_v24 = vadd.f32 %v498_v8, %v493_v20  ;;  %v503_v25 = vadd.f32 %v499_v14, %v494_v21  ;;  %v473_v26 = vadd.f32 %v725_v61, %v472_v12 }
 0x2eb   :  { %592 = vmatmul.f32.vlgmr.msrb.gmra.mxu0 %v502_v24  ;;  %615 = vmatmul.f32.vlgmr.msrb.gmra.mxu1 %v503_v25  ;;  %v477_v28 = vsel %vm476_vm7, %v725_v61, %v473_v26 }
 0x2ec   :  { %638 = vmatmul.f32.vlgmr.msrb.gmra.mxu2 %v502_v24  ;;  %661 = vmatmul.f32.vlgmr.msrb.gmra.mxu3 %v503_v25  ;;  %v482_v2 = vsel %vm479_vm8, %v481_v27, %v477_v28 }
 0x2ed   :  { %v486_v7 = vmul.f32 %v482_v2, %v1072_v11  ;;  %v487_v29 = vmul.f32 %v482_v2, %v1075_v13  ;;  %v573_v11 = vperm.slane %v570_v34, 1 }
 0x2ef   :  { %v495_v30 = vmul.f32 %v489_v1, %v486_v7  ;;  %v496_v31 = vmul.f32 %v490_v6, %v487_v29 }
 0x2f1   :  { %v504_v32 = vadd.f32 %v498_v8, %v495_v30  ;;  %v505_v33 = vadd.f32 %v499_v14, %v496_v31 }
 0x2f3   :  { %595 = vmatmul.f32.gmra.mxu0 %v504_v32  ;;  %618 = vmatmul.f32.gmra.mxu1 %v505_v33 }
 0x2f4   :  { %641 = vmatmul.f32.gmra.mxu2 %v504_v32  ;;  %664 = vmatmul.f32.gmra.mxu3 %v505_v33 }
 0x368   :  { %v593_v36 = vpop.f32.mrf.mxu0  ;;  %v616_v37 = vpop.f32.mrf.mxu1 }
 0x369   :  { %v594_v15 = vadd.f32 %v593_v36, %v572_v35 }
 0x36b   :  { %v617_v16 = vadd.f32 %v616_v37, %v594_v15 }
 0x36d   :  { %v668_v13 = vadd.f32 %v617_v16, %v1044_v53 }
 0x36f   :  { %672 = vst [vmem:[#allocation13] sm:$0xff] %v668_v13  ;;  %v639_v38 = vpop.f32.mrf.mxu2  ;;  %v662_v39 = vpop.f32.mrf.mxu3 }
 0x370   :  { %v640_v40 = vadd.f32 %v639_v38, %v573_v11  ;;  %v596_v41 = vpop.f32.mrf.mxu0  ;;  %v619_v44 = vpop.f32.mrf.mxu1 }
 0x371   :  { %v597_v42 = vadd.f32 %v596_v41, %v572_v35 }
 0x372   :  { %v663_v43 = vadd.f32 %v662_v39, %v640_v40 }
 0x373   :  { %v620_v45 = vadd.f32 %v619_v44, %v597_v42 }
 0x374   :  { %v669_v46 = vadd.f32 %v663_v43, %v1047_v54 }
 0x375   :  { %v670_v47 = vadd.f32 %v620_v45, %v1052_v63 }
 0x376   :  { %673 = vst [vmem:[#allocation13 + $0x8] sm:$0xff] %v669_v46 }
 0x377   :  { %674 = vst [vmem:[#allocation13 + $0x10] sm:$0xff] %v670_v47  ;;  %v642_v48 = vpop.f32.mrf.mxu2  ;;  %v665_v50 = vpop.f32.mrf.mxu3 }
 0x378   :  { %v643_v49 = vadd.f32 %v642_v48, %v573_v11 }
 0x37a   :  { %v666_v53 = vadd.f32 %v665_v50, %v643_v49 }
 0x37c   :  { %v671_v51 = vadd.f32 %v666_v53, %v1055_v0 }
 0x37e   :  { %675 = vst [vmem:[#allocation13 + $0x18] sm:$0xff] %v671_v51 }
 0x37f   :  { %688 = dma.vmem_to_hbm [thread:$0]  %s681_s20, 512, %s683_s1, [#allocation4], %s905_s17, %s905_s17, %s906_s18  }
 0x380   :  { %902 = dma.done.wait [#allocation4], 512  }
 0x381   :  { %903 = vsyncadd [#allocation4], 4294966784 }
 0x382   :  { %693 = vsyncpa [#allocation3], 1 }
 0x383   :  { %694 = vsyncpa [#allocation6], 1 }
 0x384   :  { %695 = vsyncpa [#allocation9], 1 }
 0x385   :  { %696 = vsyncpa [#allocation12], 1 }
 0x386   :  { %697 = vsyncpa [#allocation4], 1 }

</bundles_post_ra>
